<compile_context>
chip_gen: v7x
topology: tpu7x:2x2x1
jax: 0.10.0
libtpu: 0.0.40
codegen_flags: <defaults>
</compile_context>

<pallas_src>
import functools
import math

import jax
import jax.numpy as jnp
import numpy as np
from jax import lax
from jax.experimental import pallas as pl
from jax.experimental.pallas import tpu as pltpu


def bert_self_attn_kernel(x_ref, w_ref, b_ref, mask_ref, out_ref, *,
                          num_heads, head_dim):
    """One grid step = one batch row; all heads computed here."""
    x = x_ref[0]                       # [S, H]  bf16
    w = w_ref[...]                     # [H, 3H] bf16 (pre-transposed, Q|K|V fused,
                                       #              softmax scale folded into Q cols)

    # Fused Q/K/V projection: single MXU matmul, f32 accumulation + f32 bias,
    # then ONE cast to bf16 (the f32 copy is never needed again).
    qkv = (jnp.dot(x, w, preferred_element_type=jnp.float32)
           + b_ref[...]).astype(jnp.bfloat16)                                    # [S, 3H]

    mask = mask_ref[0]                 # [1, S] additive attention mask (f32)
    all_head = num_heads * head_dim

    for h in range(num_heads):         # static unroll over heads (static slices)
        lo = h * head_dim
        q = qkv[:, lo:lo + head_dim]                                             # [S, dh]
        k = qkv[:, all_head + lo:all_head + lo + head_dim]
        v = qkv[:, 2 * all_head + lo:2 * all_head + lo + head_dim]

        # q @ k^T without an explicit transpose (contract last dims on the MXU).
        # The 1/sqrt(dh) scale is already baked into q via the wrapper.
        scores = lax.dot_general(q, k, (((1,), (1,)), ((), ())),
                                 preferred_element_type=jnp.float32)             # [S, S]
        scores = scores + mask          # broadcast [1, S] over query rows

        # Numerically-stable softmax, f32 on VPU/EUP.
        m = jnp.max(scores, axis=-1, keepdims=True)
        e = jnp.exp(scores - m)
        denom = jnp.sum(e, axis=-1, keepdims=True)
        # approx reciprocal -> ~1e-3 relative error on probs; covered by tolerance.
        probs = e * pl.reciprocal(denom, approx=True)

        ctx = jnp.dot(probs.astype(jnp.bfloat16), v,
                      preferred_element_type=jnp.float32)                        # [S, dh]

        # Store each head as it is produced (bounds live ranges; no lane-axis
        # concat).  Heads laid out along H reproduce PyTorch's
        # permute(0,2,1,3).view(B, S, H) exactly.
        out_ref[0, :, lo:lo + head_dim] = ctx.astype(out_ref.dtype)


def _auto_vmem_limit_bytes(S, H, num_heads):
    """Raise the scoped-VMEM limit (toward physical) when whole-row softmax
    temps would not fit the smallest default scoped limit.  Returns None when
    the defaults are plenty (small shapes)."""
    est = (
        H * 3 * H * 2                  # resident fused weight (bf16)
        + S * 3 * H * (4 + 2)          # qkv f32 accumulate + bf16 copy
        + 3 * 4 * S * S                # scores / e / probs f32 temps (per head)
        + 2 * 2 * (S * H * 2)          # double-buffered x blocks (bf16)
        + 2 * 2 * (S * H * 4)          # double-buffered out blocks (f32)
        + (1 << 20)                    # slack
    )
    smallest_default = 16 * 1024 * 1024          # v5e default scoped limit
    if est <= smallest_default:
        return None
    try:
        physical = pltpu.get_tpu_info().vmem_capacity_bytes
    except Exception:
        physical = 64 * 1024 * 1024              # conservative (v7x physical)
    return int(min(est * 3 // 2, physical))


def bert_self_attention(hidden_states, attention_mask, wq, wk, wv, bq, bk, bv,
                        num_heads, *, out_dtype=jnp.float32):
    """hidden_states: [B, S, H] f32; attention_mask: additive mask [B, S].
    wq/wk/wv: [H, H] PyTorch-layout (out, in); bq/bk/bv: [H].
    out_dtype: set to jnp.bfloat16 to halve output HBM writeback if the
    downstream projection accepts bf16 (default f32 matches PyTorch)."""
    B, S, H = hidden_states.shape
    dh = H // num_heads
    scale = 1.0 / math.sqrt(dh)

    # ---- one-time layout plumbing (plain JAX, outside the kernel) ----
    # Fused, pre-transposed QKV weight: [H_in, 3*H_out], columns = Q | K | V.
    # Softmax scale folded into the Q columns AND the Q bias (scores are linear
    # in q, so scaling (Wq, bq) == scaling scores).
    w_qkv = jnp.concatenate([wq.T * scale, wk.T, wv.T], axis=1).astype(jnp.bfloat16)
    b_qkv = jnp.concatenate([bq * scale, bk, bv]).reshape(1, 3 * H).astype(jnp.float32)
    x_bf16 = hidden_states.astype(jnp.bfloat16)
    mask3 = attention_mask.reshape(B, 1, S).astype(jnp.float32)

    kernel = functools.partial(bert_self_attn_kernel,
                               num_heads=num_heads, head_dim=dh)

    out = pl.pallas_call(
        kernel,
        out_shape=jax.ShapeDtypeStruct((B, S, H), out_dtype),
        grid_spec=pltpu.PrefetchScalarGridSpec(
            num_scalar_prefetch=0,
            grid=(B,),
            in_specs=[
                pl.BlockSpec((1, S, H), lambda b: (b, 0, 0)),      # x (bf16)
                pl.BlockSpec((H, 3 * H), lambda b: (0, 0)),        # fused W (VMEM-resident)
                pl.BlockSpec((1, 3 * H), lambda b: (0, 0)),        # fused bias
                pl.BlockSpec((1, 1, S), lambda b: (b, 0, 0)),      # additive mask
            ],
            out_specs=pl.BlockSpec((1, S, H), lambda b: (b, 0, 0)),
        ),
        compiler_params=pltpu.CompilerParams(
            dimension_semantics=("parallel",),
            vmem_limit_bytes=_auto_vmem_limit_bytes(S, H, num_heads)),
    )(x_bf16, w_qkv, b_qkv, mask3)

    return out


def reference_attention(x, mask, wq, wk, wv, bq, bk, bv, num_heads):
    B, S, H = x.shape
    dh = H // num_heads

    def split(t):
        return t.reshape(B, S, num_heads, dh).transpose(0, 2, 1, 3)

    q = split(x @ wq.T + bq)
    k = split(x @ wk.T + bk)
    v = split(x @ wv.T + bv)
    scores = jnp.einsum("bhqd,bhkd->bhqk", q, k) / math.sqrt(dh)
    scores = scores + mask[:, None, None, :]
    probs = jax.nn.softmax(scores, axis=-1)
    ctx = jnp.einsum("bhqk,bhkd->bhqd", probs, v)
    return ctx.transpose(0, 2, 1, 3).reshape(B, S, H)


if __name__ == "__main__":
    # NOTE: these are tiny correctness-test shapes; benchmark/tune with real
    # BERT shapes (e.g. B>=8, S=512, H=768, nh=12) -- at S=8/H=32 every lane
    # dim is below vreg width and timings are meaningless.
    B, S, H = 2, 8, 32
    num_heads = 4

    key = jax.random.PRNGKey(0)
    k1, k2, k3, k4, k5, k6, k7 = jax.random.split(key, 7)

    hidden_states = jax.random.normal(k1, (B, S, H), dtype=jnp.float32)

    # Deterministic parameter init (PyTorch Linear shapes: W [H, H], b [H])
    wq = jax.random.normal(k2, (H, H), dtype=jnp.float32) * 0.05
    wk = jax.random.normal(k3, (H, H), dtype=jnp.float32) * 0.05
    wv = jax.random.normal(k4, (H, H), dtype=jnp.float32) * 0.05
    bq = jax.random.normal(k5, (H,), dtype=jnp.float32) * 0.01
    bk = jax.random.normal(k6, (H,), dtype=jnp.float32) * 0.01
    bv = jax.random.normal(k7, (H,), dtype=jnp.float32) * 0.01

    # Additive attention mask (BERT-style extended mask): mask out last 2
    # positions of the second batch element.
    mask = jnp.zeros((B, S), dtype=jnp.float32)
    mask = mask.at[1, -2:].set(-10000.0)

    out = bert_self_attention(hidden_states, mask, wq, wk, wv, bq, bk, bv, num_heads)
    out = jax.block_until_ready(out)

    ref = reference_attention(hidden_states, mask, wq, wk, wv, bq, bk, bv, num_heads)
    # bf16 MXU operands (f32 accumulation) + approx reciprocal -> relaxed tolerance.
    np.testing.assert_allclose(np.asarray(out), np.asarray(ref), rtol=2e-2, atol=2e-2)

    print("KERNEL_OK")
</pallas_src>

<mosaic_0001>
module attributes {stable_mosaic.version = 11 : i64} {
  func.func @bert_self_attn_kernel(%arg0: i32, %arg1: memref<1x8x32xbf16, #tpu.memory_space<vmem>>, %arg2: memref<32x96xbf16, #tpu.memory_space<vmem>>, %arg3: memref<1x96xf32, #tpu.memory_space<vmem>>, %arg4: memref<1x1x8xf32, #tpu.memory_space<vmem>>, %arg5: memref<1x8x32xf32, #tpu.memory_space<vmem>>) attributes {dimension_semantics = [#tpu.dimension_semantics<parallel>], iteration_bounds = array<i64: 2>, scalar_prefetch = 0 : i64, scratch_operands = 0 : i64, tpu.core_type = #tpu.core_type<tc>, window_params = [{transform_indices = @transform_0, window_bounds = array<i64: 1, 8, 32>}, {pipeline_mode = #tpu.pipeline_mode<synchronous>, transform_indices = @transform_1, window_bounds = array<i64: 32, 96>}, {pipeline_mode = #tpu.pipeline_mode<synchronous>, transform_indices = @transform_2, window_bounds = array<i64: 1, 96>}, {transform_indices = @transform_3, window_bounds = array<i64: 1, 1, 8>}, {transform_indices = @transform_4, window_bounds = array<i64: 1, 8, 32>}]} {
    %c0 = arith.constant 0 : index
    %c0_0 = arith.constant 0 : index
    %c0_1 = arith.constant 0 : index
    %0 = vector.load %arg1[%c0, %c0_0, %c0_1] : memref<1x8x32xbf16, #tpu.memory_space<vmem>>, vector<1x8x32xbf16>
    %1 = vector.shape_cast %0 : vector<1x8x32xbf16> to vector<8x32xbf16>
    %c0_2 = arith.constant 0 : index
    %c0_3 = arith.constant 0 : index
    %2 = vector.load %arg2[%c0_2, %c0_3] : memref<32x96xbf16, #tpu.memory_space<vmem>>, vector<32x96xbf16>
    %cst = arith.constant dense<0.000000e+00> : vector<8x96xf32>
    %3 = tpu.matmul %1, %2, %cst {dimension_numbers = #tpu.dot_dimension_numbers<[1], [0], [0], [1], [0, 0, 1, 1], [], []>} : vector<8x32xbf16>, vector<32x96xbf16>, vector<8x96xf32> -> vector<8x96xf32>
    %c0_4 = arith.constant 0 : index
    %c0_5 = arith.constant 0 : index
    %4 = vector.load %arg3[%c0_4, %c0_5] : memref<1x96xf32, #tpu.memory_space<vmem>>, vector<1x96xf32>
    %5 = vector.broadcast %4 : vector<1x96xf32> to vector<8x96xf32>
    %6 = arith.addf %3, %5 : vector<8x96xf32>
    %7 = arith.truncf %6 : vector<8x96xf32> to vector<8x96xbf16>
    %c0_6 = arith.constant 0 : index
    %c0_7 = arith.constant 0 : index
    %c0_8 = arith.constant 0 : index
    %8 = vector.load %arg4[%c0_6, %c0_7, %c0_8] : memref<1x1x8xf32, #tpu.memory_space<vmem>>, vector<1x1x8xf32>
    %9 = vector.shape_cast %8 : vector<1x1x8xf32> to vector<1x8xf32>
    %10 = vector.extract_strided_slice %7 {offsets = [0, 0], sizes = [8, 8], strides = [1, 1]} : vector<8x96xbf16> to vector<8x8xbf16>
    %11 = vector.extract_strided_slice %7 {offsets = [0, 32], sizes = [8, 8], strides = [1, 1]} : vector<8x96xbf16> to vector<8x8xbf16>
    %12 = vector.extract_strided_slice %7 {offsets = [0, 64], sizes = [8, 8], strides = [1, 1]} : vector<8x96xbf16> to vector<8x8xbf16>
    %cst_9 = arith.constant dense<0.000000e+00> : vector<8x8xf32>
    %13 = tpu.matmul %10, %11, %cst_9 {dimension_numbers = #tpu.dot_dimension_numbers<[1], [1], [0], [0], [0, 0, 1, 0], [], []>} : vector<8x8xbf16>, vector<8x8xbf16>, vector<8x8xf32> -> vector<8x8xf32>
    %14 = vector.broadcast %9 : vector<1x8xf32> to vector<8x8xf32>
    %15 = arith.addf %13, %14 : vector<8x8xf32>
    %cst_10 = arith.constant dense<0xFF800000> : vector<8xf32>
    %16 = vector.multi_reduction <maximumf>, %15, %cst_10 [1] : vector<8x8xf32> to vector<8xf32>
    %17 = vector.shape_cast %16 : vector<8xf32> to vector<8x1xf32>
    %18 = vector.broadcast %17 : vector<8x1xf32> to vector<8x8xf32>
    %19 = arith.subf %15, %18 : vector<8x8xf32>
    %20 = math.exp %19 : vector<8x8xf32>
    %cst_11 = arith.constant dense<0.000000e+00> : vector<8xf32>
    %21 = vector.multi_reduction <add>, %20, %cst_11 [1] : vector<8x8xf32> to vector<8xf32>
    %22 = vector.shape_cast %21 : vector<8xf32> to vector<8x1xf32>
    %23 = tpu.reciprocal %22 {approx = true} : vector<8x1xf32> -> vector<8x1xf32>
    %24 = vector.broadcast %23 : vector<8x1xf32> to vector<8x8xf32>
    %25 = arith.mulf %20, %24 : vector<8x8xf32>
    %26 = arith.truncf %25 : vector<8x8xf32> to vector<8x8xbf16>
    %cst_12 = arith.constant dense<0.000000e+00> : vector<8x8xf32>
    %27 = tpu.matmul %26, %12, %cst_12 {dimension_numbers = #tpu.dot_dimension_numbers<[1], [0], [0], [1], [0, 0, 1, 1], [], []>} : vector<8x8xbf16>, vector<8x8xbf16>, vector<8x8xf32> -> vector<8x8xf32>
    %c0_13 = arith.constant 0 : index
    %c0_14 = arith.constant 0 : index
    %c0_15 = arith.constant 0 : index
    %28 = vector.load %arg5[%c0_13, %c0_14, %c0_15] : memref<1x8x32xf32, #tpu.memory_space<vmem>>, vector<1x8x8xf32>
    %29 = vector.shape_cast %28 : vector<1x8x8xf32> to vector<8x8xf32>
    %30 = vector.shape_cast %27 : vector<8x8xf32> to vector<1x8x8xf32>
    tpu.vector_store %arg5[%c0_13, %c0_14, %c0_15], %30 {strides = array<i32>} : memref<1x8x32xf32, #tpu.memory_space<vmem>>, vector<1x8x8xf32>,
    %31 = vector.extract_strided_slice %7 {offsets = [0, 8], sizes = [8, 8], strides = [1, 1]} : vector<8x96xbf16> to vector<8x8xbf16>
    %32 = vector.extract_strided_slice %7 {offsets = [0, 40], sizes = [8, 8], strides = [1, 1]} : vector<8x96xbf16> to vector<8x8xbf16>
    %33 = vector.extract_strided_slice %7 {offsets = [0, 72], sizes = [8, 8], strides = [1, 1]} : vector<8x96xbf16> to vector<8x8xbf16>
    %cst_16 = arith.constant dense<0.000000e+00> : vector<8x8xf32>
    %34 = tpu.matmul %31, %32, %cst_16 {dimension_numbers = #tpu.dot_dimension_numbers<[1], [1], [0], [0], [0, 0, 1, 0], [], []>} : vector<8x8xbf16>, vector<8x8xbf16>, vector<8x8xf32> -> vector<8x8xf32>
    %35 = vector.broadcast %9 : vector<1x8xf32> to vector<8x8xf32>
    %36 = arith.addf %34, %35 : vector<8x8xf32>
    %cst_17 = arith.constant dense<0xFF800000> : vector<8xf32>
    %37 = vector.multi_reduction <maximumf>, %36, %cst_17 [1] : vector<8x8xf32> to vector<8xf32>
    %38 = vector.shape_cast %37 : vector<8xf32> to vector<8x1xf32>
    %39 = vector.broadcast %38 : vector<8x1xf32> to vector<8x8xf32>
    %40 = arith.subf %36, %39 : vector<8x8xf32>
    %41 = math.exp %40 : vector<8x8xf32>
    %cst_18 = arith.constant dense<0.000000e+00> : vector<8xf32>
    %42 = vector.multi_reduction <add>, %41, %cst_18 [1] : vector<8x8xf32> to vector<8xf32>
    %43 = vector.shape_cast %42 : vector<8xf32> to vector<8x1xf32>
    %44 = tpu.reciprocal %43 {approx = true} : vector<8x1xf32> -> vector<8x1xf32>
    %45 = vector.broadcast %44 : vector<8x1xf32> to vector<8x8xf32>
    %46 = arith.mulf %41, %45 : vector<8x8xf32>
    %47 = arith.truncf %46 : vector<8x8xf32> to vector<8x8xbf16>
    %cst_19 = arith.constant dense<0.000000e+00> : vector<8x8xf32>
    %48 = tpu.matmul %47, %33, %cst_19 {dimension_numbers = #tpu.dot_dimension_numbers<[1], [0], [0], [1], [0, 0, 1, 1], [], []>} : vector<8x8xbf16>, vector<8x8xbf16>, vector<8x8xf32> -> vector<8x8xf32>
    %c0_20 = arith.constant 0 : index
    %c0_21 = arith.constant 0 : index
    %c8 = arith.constant 8 : index
    %49 = vector.load %arg5[%c0_20, %c0_21, %c8] : memref<1x8x32xf32, #tpu.memory_space<vmem>>, vector<1x8x8xf32>
    %50 = vector.shape_cast %49 : vector<1x8x8xf32> to vector<8x8xf32>
    %51 = vector.shape_cast %48 : vector<8x8xf32> to vector<1x8x8xf32>
    tpu.vector_store %arg5[%c0_20, %c0_21, %c8], %51 {strides = array<i32>} : memref<1x8x32xf32, #tpu.memory_space<vmem>>, vector<1x8x8xf32>,
    %52 = vector.extract_strided_slice %7 {offsets = [0, 16], sizes = [8, 8], strides = [1, 1]} : vector<8x96xbf16> to vector<8x8xbf16>
    %53 = vector.extract_strided_slice %7 {offsets = [0, 48], sizes = [8, 8], strides = [1, 1]} : vector<8x96xbf16> to vector<8x8xbf16>
    %54 = vector.extract_strided_slice %7 {offsets = [0, 80], sizes = [8, 8], strides = [1, 1]} : vector<8x96xbf16> to vector<8x8xbf16>
    %cst_22 = arith.constant dense<0.000000e+00> : vector<8x8xf32>
    %55 = tpu.matmul %52, %53, %cst_22 {dimension_numbers = #tpu.dot_dimension_numbers<[1], [1], [0], [0], [0, 0, 1, 0], [], []>} : vector<8x8xbf16>, vector<8x8xbf16>, vector<8x8xf32> -> vector<8x8xf32>
    %56 = vector.broadcast %9 : vector<1x8xf32> to vector<8x8xf32>
    %57 = arith.addf %55, %56 : vector<8x8xf32>
    %cst_23 = arith.constant dense<0xFF800000> : vector<8xf32>
    %58 = vector.multi_reduction <maximumf>, %57, %cst_23 [1] : vector<8x8xf32> to vector<8xf32>
    %59 = vector.shape_cast %58 : vector<8xf32> to vector<8x1xf32>
    %60 = vector.broadcast %59 : vector<8x1xf32> to vector<8x8xf32>
    %61 = arith.subf %57, %60 : vector<8x8xf32>
    %62 = math.exp %61 : vector<8x8xf32>
    %cst_24 = arith.constant dense<0.000000e+00> : vector<8xf32>
    %63 = vector.multi_reduction <add>, %62, %cst_24 [1] : vector<8x8xf32> to vector<8xf32>
    %64 = vector.shape_cast %63 : vector<8xf32> to vector<8x1xf32>
    %65 = tpu.reciprocal %64 {approx = true} : vector<8x1xf32> -> vector<8x1xf32>
    %66 = vector.broadcast %65 : vector<8x1xf32> to vector<8x8xf32>
    %67 = arith.mulf %62, %66 : vector<8x8xf32>
    %68 = arith.truncf %67 : vector<8x8xf32> to vector<8x8xbf16>
    %cst_25 = arith.constant dense<0.000000e+00> : vector<8x8xf32>
    %69 = tpu.matmul %68, %54, %cst_25 {dimension_numbers = #tpu.dot_dimension_numbers<[1], [0], [0], [1], [0, 0, 1, 1], [], []>} : vector<8x8xbf16>, vector<8x8xbf16>, vector<8x8xf32> -> vector<8x8xf32>
    %c0_26 = arith.constant 0 : index
    %c0_27 = arith.constant 0 : index
    %c16 = arith.constant 16 : index
    %70 = vector.load %arg5[%c0_26, %c0_27, %c16] : memref<1x8x32xf32, #tpu.memory_space<vmem>>, vector<1x8x8xf32>
    %71 = vector.shape_cast %70 : vector<1x8x8xf32> to vector<8x8xf32>
    %72 = vector.shape_cast %69 : vector<8x8xf32> to vector<1x8x8xf32>
    tpu.vector_store %arg5[%c0_26, %c0_27, %c16], %72 {strides = array<i32>} : memref<1x8x32xf32, #tpu.memory_space<vmem>>, vector<1x8x8xf32>,
    %73 = vector.extract_strided_slice %7 {offsets = [0, 24], sizes = [8, 8], strides = [1, 1]} : vector<8x96xbf16> to vector<8x8xbf16>
    %74 = vector.extract_strided_slice %7 {offsets = [0, 56], sizes = [8, 8], strides = [1, 1]} : vector<8x96xbf16> to vector<8x8xbf16>
    %75 = vector.extract_strided_slice %7 {offsets = [0, 88], sizes = [8, 8], strides = [1, 1]} : vector<8x96xbf16> to vector<8x8xbf16>
    %cst_28 = arith.constant dense<0.000000e+00> : vector<8x8xf32>
    %76 = tpu.matmul %73, %74, %cst_28 {dimension_numbers = #tpu.dot_dimension_numbers<[1], [1], [0], [0], [0, 0, 1, 0], [], []>} : vector<8x8xbf16>, vector<8x8xbf16>, vector<8x8xf32> -> vector<8x8xf32>
    %77 = vector.broadcast %9 : vector<1x8xf32> to vector<8x8xf32>
    %78 = arith.addf %76, %77 : vector<8x8xf32>
    %cst_29 = arith.constant dense<0xFF800000> : vector<8xf32>
    %79 = vector.multi_reduction <maximumf>, %78, %cst_29 [1] : vector<8x8xf32> to vector<8xf32>
    %80 = vector.shape_cast %79 : vector<8xf32> to vector<8x1xf32>
    %81 = vector.broadcast %80 : vector<8x1xf32> to vector<8x8xf32>
    %82 = arith.subf %78, %81 : vector<8x8xf32>
    %83 = math.exp %82 : vector<8x8xf32>
    %cst_30 = arith.constant dense<0.000000e+00> : vector<8xf32>
    %84 = vector.multi_reduction <add>, %83, %cst_30 [1] : vector<8x8xf32> to vector<8xf32>
    %85 = vector.shape_cast %84 : vector<8xf32> to vector<8x1xf32>
    %86 = tpu.reciprocal %85 {approx = true} : vector<8x1xf32> -> vector<8x1xf32>
    %87 = vector.broadcast %86 : vector<8x1xf32> to vector<8x8xf32>
    %88 = arith.mulf %83, %87 : vector<8x8xf32>
    %89 = arith.truncf %88 : vector<8x8xf32> to vector<8x8xbf16>
    %cst_31 = arith.constant dense<0.000000e+00> : vector<8x8xf32>
    %90 = tpu.matmul %89, %75, %cst_31 {dimension_numbers = #tpu.dot_dimension_numbers<[1], [0], [0], [1], [0, 0, 1, 1], [], []>} : vector<8x8xbf16>, vector<8x8xbf16>, vector<8x8xf32> -> vector<8x8xf32>
    %c0_32 = arith.constant 0 : index
    %c0_33 = arith.constant 0 : index
    %c24 = arith.constant 24 : index
    %91 = vector.load %arg5[%c0_32, %c0_33, %c24] : memref<1x8x32xf32, #tpu.memory_space<vmem>>, vector<1x8x8xf32>
    %92 = vector.shape_cast %91 : vector<1x8x8xf32> to vector<8x8xf32>
    %93 = vector.shape_cast %90 : vector<8x8xf32> to vector<1x8x8xf32>
    tpu.vector_store %arg5[%c0_32, %c0_33, %c24], %93 {strides = array<i32>} : memref<1x8x32xf32, #tpu.memory_space<vmem>>, vector<1x8x8xf32>,
    return
  }
  func.func @transform_0(%arg0: i32) -> (i32, i32, i32) {
    %c0_i32 = arith.constant 0 : i32
    %c0_i32_0 = arith.constant 0 : i32
    %c0_i32_1 = arith.constant 0 : i32
    return %arg0, %c0_i32, %c0_i32_0 : i32, i32, i32
  }
  func.func @transform_1(%arg0: i32) -> (i32, i32) {
    %c0_i32 = arith.constant 0 : i32
    %c0_i32_0 = arith.constant 0 : i32
    %c0_i32_1 = arith.constant 0 : i32
    return %c0_i32, %c0_i32_0 : i32, i32
  }
  func.func @transform_2(%arg0: i32) -> (i32, i32) {
    %c0_i32 = arith.constant 0 : i32
    %c0_i32_0 = arith.constant 0 : i32
    %c0_i32_1 = arith.constant 0 : i32
    return %c0_i32, %c0_i32_0 : i32, i32
  }
  func.func @transform_3(%arg0: i32) -> (i32, i32, i32) {
    %c0_i32 = arith.constant 0 : i32
    %c0_i32_0 = arith.constant 0 : i32
    %c0_i32_1 = arith.constant 0 : i32
    return %arg0, %c0_i32, %c0_i32_0 : i32, i32, i32
  }
  func.func @transform_4(%arg0: i32) -> (i32, i32, i32) {
    %c0_i32 = arith.constant 0 : i32
    %c0_i32_0 = arith.constant 0 : i32
    %c0_i32_1 = arith.constant 0 : i32
    return %arg0, %c0_i32, %c0_i32_0 : i32, i32, i32
  }
}

</mosaic_0001>

<bundles_post_ra>
// kernel: tpu_custom_call.1
= control target key start
LH: loop header
LB: loop body
LE: loop exit
PB: predicated region body
PF: predicated region fallthrough
CT: control target
= control target key end

     0   :  { %9 = vsyncpa [#allocation3], 0  ;;  %s1532_s0 = inlined_call_operand.hbm [shape: bf16[2,8,32], index: 0, kind: input, shape index: {}]   ;;  %s1533_s1 = inlined_call_operand.hbm [shape: bf16[32,96], index: 1, kind: input, shape index: {}]   ;;  %s1534_s2 = inlined_call_operand.vmem [shape: f32[1,96], index: 2, kind: input, shape index: {}]   ;;  %s1535_s3 = inlined_call_operand.vmem [shape: f32[2,1,8], index: 3, kind: input, shape index: {}]   ;;  %s1536_s4 = inlined_call_operand.hbm [shape: f32[2,8,32], index: 4, kind: output, shape index: {}]  }
   0x1   :  { %11 = vsyncpa [#allocation3 + $0x1], 0 }
   0x2   :  { %12 = vsyncpa [#allocation6], 0 }
   0x3   :  { %13 = vsyncpa [#allocation4], 0 }
   0x4   :  { %15 = vsyncpa [#allocation4 + $0x1], 0  ;;  %s1253_s15 = smov 0   ;;  %s1255_s16 = smov 0  }
   0x5   :  { %s1257_s17 = smov 0   ;;  %s1259_s18 = smov 0  }
   0x6 LB: > { %s1274_s19 = sadd.s32 4294967295, %s1205_s18   ;;  %s882_s20 = sadd.s32 4294967294, %s1205_s18   ;;  %s1205_s18 = sphi %s1259_s18, %s1556_s18   ;;  %s1201_s17 = sphi %s1257_s17, %s1555_s17   ;;  %s1197_s16 = sphi %s1255_s16, %s1554_s16   ;;  %s1193_s15 = sphi %s1253_s15, %s1553_s15  }
   0x7   : > { %p41_p0 = scmp.ne.s32.totalorder %s1197_s16, %s1193_s15  ;;  %p1537_p1 = scmp.eq.s32.totalorder %s1274_s19, 0 }
   0x8   : > { %p139_p3 = scmp.eq.s32.totalorder %s882_s20, 1  ;;  %p883_p5 = scmp.ge.s32.totalorder %s1205_s18, 1 }
   0x9   : > { %p1283_p4 = por %p1537_p1, %p41_p0  ;;  %p146_p7 = scmp.lt.s32.totalorder %s1205_s18, 3 }
   0xa   : > { %p1288_p6 = por %p139_p3, %p41_p0  ;;  %s1207_s24 = smov [#allocation5]  }
   0xb   : > { %s1540_s21 = scalar_select %p1283_p4, 1, 0 }
   0xc   : > { %s1541_s22 = scalar_select %p1288_p6, 1, 0 }
   0xd   : > { %p1293_p8 = pnand %p883_p5, %p146_p7  ;;  %s158_s25 = sshll.u32 %s1207_s24, 4  ;;  %s1297_s25 = int_to_ptr.vmem [resolvable:$true] %s158_s25 }
   0xe   : > { %s1309_s27 = sadd.s32 1, %s1205_s18   ;;  %s28_s28 = sadd.s32 1, %s1201_s17 }
   0xf   : > { %s1542_s23 = scalar_select %p1293_p8, 1, 0 }
  0x10   : > { %p992_p9 = pneg %p1293_p8  ;;  %s25_s29 = ssub.s32 %s1205_s18, %s1309_s27 }
  0x11   : > { %s1077_s6 = scalar_lea.hbm %s1533_s1, 256 }
  0x12   : > { %p1304_p11 = pnand %p992_p9, %p1537_p1  ;;  %p1078_p12 = scmp.ne.s32.totalorder %s1533_s1, %s1077_s6 }
  0x13   : > { %p1084_p5 = scmp.lt.u32.totalorder %s1077_s6, %s1533_s1 }
  0x14   : > { %p1079_p13 = pneg %p1304_p11 }
  0x16   : > { %p1080_p0 = pnand %p1079_p13, %p1078_p12 }
  0x18   : > { %p1081_p3 = pneg %p1080_p0 }
  0x1a   : > { %p1086_p7 = pnand %p1084_p5, %p1081_p3 }
  0x1c   : > { %1089 = shalt.err (!%p1086_p7)
}
  0x1d   : > { %s1090_s11 = scalar_lea.vmem %s1297_s25, 256  ;;  %p1098_p2 = scmp.lt.s32.totalorder %s1297_s25, %s1297_s25 }
  0x1e   : > { %p1091_p9 = scmp.ne.s32.totalorder %s1297_s25, %s1090_s11  ;;  %p1099_p6 = scmp.lt.s32.totalorder %s1090_s11, %s1090_s11 }
  0x20   : > { %p1093_p10 = pnand %p1091_p9, %p1079_p13  ;;  %p1100_p4 = por %p1099_p6, %p1098_p2 }
  0x22   : > { %p1094_p1 = pneg %p1093_p10 }
  0x24   : > { %p1101_p8 = pnand %p1100_p4, %p1094_p1 }
  0x26   : > { %1104 = shalt.err (!%p1101_p8)
}
  0x27   : > { %s1208_s12 = smov 64   ;;  %s1209_s13 = smov 4  }
  0x28   : > { %995 = dma.hbm_to_vmem [thread:$0]  (!%p1304_p11), %s1533_s1, 256, %s1297_s25, [#allocation6], %s1208_s12, %s1208_s12, %s1209_s13  }
  0x29   : > { %p26_p2 = scmp.eq.s32.totalorder %s25_s29, 0  ;;  %p35_p1 = scmp.ne.s32.totalorder %s1201_s17, %s1197_s16 }
  0x2a   : > { %p36_p4 = scmp.eq.s32.totalorder %s1205_s18, 0  ;;  %p1005_p6 = scmp.lt.s32.totalorder %s1205_s18, 2 }
  0x2b   : > { %s1340_s24 = scalar_select %p26_p2, %s1201_s17, %s28_s28  }
  0x2c   : > { %p37_p8 = por %p36_p4, %p35_p1  ;;  %p1544_p10 = scmp.eq.s32.totalorder %s1274_s19, 1 }
  0x2d   : > { %s175_s5 = sand.u32 1, %s1201_s17   ;;  %s887_s6 = sshll.u32 %s1205_s18, 6 }
  0x2e   : > { %p1344_p12 = por %p1544_p10, %p35_p1  ;;  %s886_s7 = sshll.u32 %s175_s5, 2 }
  0x2f   : > { %s1353_s9 = scalar_lea.hbm %s1532_s0, %s887_s6  ;;  %s179_s25 = scalar_lea.vmem [#allocation2], %s886_s7 }
  0x30   : > { %s186_s28 = sshll.u32 %s179_s25, 4  ;;  %p1355_p11 = pnand %p1005_p6, %p37_p8  ;;  %s1359_s28 = int_to_ptr.vmem [resolvable:$true] %s186_s28 }
  0x31   : > { %s176_s10 = scalar_lea.sflag [#allocation3], %s175_s5  ;;  %s1105_s11 = scalar_lea.hbm %s1353_s9, 64 }
  0x32   : > { %p1106_p13 = scmp.ne.s32.totalorder %s1353_s9, %s1105_s11  ;;  %p1107_p0 = pneg %p1355_p11 }
  0x33   : > { %s1110_s14 = scalar_lea.hbm %s1532_s0, 128  ;;  %p1111_p7 = scmp.lt.u32.totalorder %s1353_s9, %s1532_s0 }
  0x34   : > { %p1108_p3 = pnand %p1107_p0, %p1106_p13  ;;  %p1112_p9 = scmp.lt.u32.totalorder %s1110_s14, %s1105_s11 }
  0x35   : > { %p1114_p1 = scmp.lt.u32.totalorder %s1105_s11, %s1353_s9 }
  0x36   : > { %p1109_p5 = pneg %p1108_p3  ;;  %p1113_p2 = por %p1112_p9, %p1111_p7 }
  0x38   : > { %p1115_p4 = por %p1114_p1, %p1113_p2 }
  0x3a   : > { %p1116_p6 = pnand %p1115_p4, %p1109_p5 }
  0x3c   : > { %1119 = shalt.err (!%p1116_p6)
}
  0x3d   : > { %s1120_s5 = scalar_lea.vmem %s1359_s28, 64  ;;  %s1210_s7 = smov [#allocation2]  }
  0x3e   : > { %p1121_p8 = scmp.ne.s32.totalorder %s1359_s28, %s1120_s5  ;;  %s1125_s26 = sshll.u32 %s1210_s7, 4  ;;  %s1126_s26 = int_to_ptr.vmem [resolvable:$false] %s1125_s26 }
  0x3f   : > { %s1127_s8 = scalar_lea.vmem %s1126_s26, 128  ;;  %p1128_p3 = scmp.lt.s32.totalorder %s1359_s28, %s1126_s26 }
  0x40   : > { %p1123_p10 = pnand %p1121_p8, %p1107_p0  ;;  %p1129_p7 = scmp.lt.s32.totalorder %s1127_s8, %s1120_s5 }
  0x42   : > { %p1124_p13 = pneg %p1123_p10  ;;  %p1130_p9 = por %p1129_p7, %p1128_p3 }
  0x44   : > { %p1131_p2 = pnand %p1130_p9, %p1124_p13 }
  0x46   : > { %1134 = shalt.err (!%p1131_p2)
}
  0x47   : > { %999 = dma.hbm_to_vmem [thread:$0]  (!%p1355_p11), %s1353_s9, 64, %s1359_s28, %s176_s10  }
  0x48   : > { %p1547_p5 = scmp.ne.s32.totalorder %s1542_s23, 0 }
  0x49   : > { %s1389_s25 = sand.u32 (!%p1547_p5), 1, %s1197_s16   ;;  %p1548_p0 = scmp.ne.s32.totalorder (!%p1547_p5), %s1540_s21, 0 }
  0x4a   : > { %201 = sbr.rel (%p1547_p5) target bundleno = 1367 (0x557), region = 36  ;;  %s889_s11 = sshll.u32 (!%p1547_p5), %s1389_s25, 2 }
  0x4b   : > { %s204_s12 = scalar_lea.sflag (!%p1547_p5), [#allocation3], %s1389_s25  ;;  %s207_s13 = scalar_lea.vmem (!%p1547_p5), [#allocation2], %s889_s11 }
  0x51   : > { %1180 = dma.done.wait (%p1548_p0), %s204_s12, 64  }
  0x52   : > { %1182 = vsyncadd (%p1548_p0), %s204_s12, 4294967232  ;;  %p1549_p1 = scmp.eq.s32.totalorder %s1274_s19, 0 }
  0x54   : > { %1184 = dma.done.wait (%p1549_p1), [#allocation6], 256   ;;  %p1550_p11 = pmov %p1549_p1 }
  0x55   : > { %v1211_v0 = vmov 0.0   ;;  %vm1212_vm0 = vmmov 0   ;;  %v1059_v1 = vld [vmem:[#allocation5] sm:$0xff]   ;;  %v1060_v2 = vld [vmem:[#allocation5 + $0x8] sm:$0xff]   ;;  %v243_v3 = vld [vmem:[%s207_s13] sm:$0xf] }
  0x56   : > { %1186 = vsyncadd (%p1550_p11), [#allocation6], 4294967040  ;;  %928 = vmatprep.subr.bf16.mxu0 %v1211_v0  ;;  %932 = vmatprep.mubr.msk.bf16.mxu0 %vm1212_vm0, %v1211_v0  ;;  %vm267_vm1 = vcmask 261120   ;;  %v892_v4 = vld [vmem:[%s1534_s2] ss:$0 sm:$0xff]  ;;  %s1213_s9 = smov 120  }
  0x57   : > { %936 = vmatprep.subr.bf16.mxu1 %v1211_v0  ;;  %938 = vmatprep.mubr.msk.bf16.mxu1 %vm1212_vm0, %v1211_v0  ;;  %s1214_s28 = smov 96   ;;  %s1215_s29 = smov 80   ;;  %vm322_vm2 = vcmask 64512   ;;  %vm386_vm3 = vcmask 1043456   ;;  %vm545_vm4 = vcmask 130112   ;;  %vm661_vm5 = vcmask 195712  }
  0x58   : > { %929 = vmatpush3.bf16.msra.mxu0 %v1059_v1  ;;  %s1216_s10 = smov 88   ;;  %s1217_s14 = smov 72   ;;  %vm777_vm6 = vcmask 261312  }
  0x59   : > { %930 = vmatprep.subr.bf16.mxu0 %v1211_v0  ;;  %s1218_s20 = smov 112   ;;  %s1219_s6 = smov 104  }
  0x5a   : > { %p239_p4 = scmp.lt.s32.totalorder %s1274_s19, 1  ;;  %s1220_s11 = smov 56  }
  0x5b   : > { %s1221_s12 = smov 64   ;;  %s1222_s13 = smov 40  }
  0x5c   : > { %931 = vmatpush3.bf16.msra.mxu0 %v1060_v2  ;;  %s240_s5 = scalar_select %p239_p4, %s1274_s19, 1 }
  0x5d   : > { %942 = vmatprep.subr.bf16.mxu0 %v1211_v0  ;;  %s1223_s21 = smov 48   ;;  %s891_s23 = sshll.u32 %s1389_s25, 3 }
  0x5e   : > { %s241_s8 = scalar_lea.vmem %s1535_s3, %s240_s5  ;;  %s780_s26 = scalar_lea.sflag [#allocation4], %s1389_s25 }
  0x5f   : > { %933 = vmatmul.mubr.msk.bf16.vlgmr.msra.gmra.mrb[0].mxu0 %vm267_vm1, %v243_v3  ;;  %v896_v22 = vld [vmem:[%s241_s8] ss:$0 sm:$0xff] }
  0x60   : > { %944 = vmatprep.mubr.msk.bf16.mxu0 %vm1212_vm0, %v1211_v0 }
 0x132   : > { %v305_v5 = vpop.f32.mrb[0].mxu0 }
 0x133   : > { %v306_v6 = vadd.f32 %v892_v4, %v305_v5  ;;  %v934_v7 = vpop.f32.mrb[1].mxu0 }
 0x134   : > { %v308_v8 = vpop.f32.mrb[2].mxu0 }
 0x135   : > { %v1414_v9 = vpack.c.bf16 %v306_v6, %v306_v6  ;;  %v935_v10 = vpop.f32.mrb[3].mxu0 }
 0x137   : > { %431 = vrot.lane.b32.xlu1 %v1414_v9, %s1213_s9  ;;  %320 = vrot.lane.b32.xlu0 %v1414_v9, %s1214_s28  ;;  %s1476_s9 = scalar_lea.vmem [#allocation7], %s891_s23  ;;  %s1224_s28 = smov 8  }
 0x13b   : > { %549 = vrot.lane.b32.xlu1 %v1414_v9, %s1215_s29  ;;  %433 = vrot.lane.b32.xlu0 %v1414_v9, %s1216_s10  ;;  %s1225_s29 = smov 16   ;;  %s1226_s10 = smov 24  }
 0x13f   : > { %665 = vrot.lane.b32.xlu1 %v1414_v9, %s1217_s14  ;;  %547 = vrot.lane.b32.xlu0 %v1414_v9, %s1218_s20  ;;  %s906_s14 = sshll.u32 %s1274_s19, 7  ;;  %s793_s20 = sshll.u32 %s1476_s9, 4  ;;  %s1489_s20 = int_to_ptr.vmem [resolvable:$true] %s793_s20 }
 0x140   : > { %s1487_s7 = scalar_lea.hbm %s1536_s4, %s906_s14  ;;  %s1135_s8 = scalar_lea.vmem %s1489_s20, 128 }
 0x141   : > { %p1136_p6 = scmp.ne.s32.totalorder %s1489_s20, %s1135_s8  ;;  %s1227_s19 = smov [#allocation7]  }
 0x143   : > { %663 = vrot.lane.b32.xlu0 %v1414_v9, %s1219_s6  ;;  %p1137_p8 = pnand %p1136_p6, %p1344_p12 }
 0x145   : > { %p1138_p10 = pneg %p1137_p8 }
 0x1a9   : > { %v321_v11 = vpop.permute.xlu0 %320  ;;  %v432_v14 = vpop.permute.xlu1 %431 }
 0x1aa   : > { %v327_v12 = vsel %vm322_vm2, %v321_v11, 0 }
 0x1ab   : > { %937 = vmatpush3.bf16.xpose.msra.mxu1 %v327_v12 }
 0x1ac   : > { %948 = vmatprep.subr.bf16.mxu1 %v1211_v0 }
 0x1ad   : > { %v434_v13 = vpop.permute.xlu0 %433  ;;  %v550_v16 = vpop.permute.xlu1 %549 }
 0x1ae   : > { %v439_v15 = vsel %vm322_vm2, %v434_v13, 0  ;;  %v555_v17 = vsel %vm322_vm2, %v550_v16, 0 }
 0x1b1   : > { %v666_v18 = vpop.permute.xlu1 %665  ;;  %v548_v19 = vpop.permute.xlu0 %547 }
 0x1b2   : > { %939 = vmatmul.mubr.msk.bf16.vlgmr.msra.gmra.mrb[0].mxu1 %vm322_vm2, %v1414_v9  ;;  %v671_v20 = vsel %vm322_vm2, %v666_v18, 0 }
 0x1b3   : > { %949 = vmatpush3.bf16.xpose.msra.mxu1 %v439_v15  ;;  %950 = vmatprep.mubr.msk.bf16.mxu1 %vm1212_vm0, %v1211_v0 }
 0x1b4   : > { %960 = vmatprep.subr.bf16.mxu1 %v1211_v0 }
 0x1b5   : > { %v664_v21 = vpop.permute.xlu0 %663 }
 0x1ba   : > { %951 = vmatmul.mubr.msk.bf16.vlgmr.msra.gmra.mrb[4].mxu1 %vm322_vm2, %v432_v14 }
 0x1bb   : > { %961 = vmatpush3.bf16.xpose.msra.mxu1 %v555_v17  ;;  %962 = vmatprep.mubr.msk.bf16.mxu1 %vm1212_vm0, %v1211_v0 }
 0x1bc   : > { %972 = vmatprep.subr.bf16.mxu1 %v1211_v0 }
 0x1c2   : > { %963 = vmatmul.mubr.msk.bf16.vlgmr.msra.gmra.mrb[8].mxu1 %vm322_vm2, %v548_v19 }
 0x1c3   : > { %973 = vmatpush3.bf16.xpose.msra.mxu1 %v671_v20  ;;  %974 = vmatprep.mubr.msk.bf16.mxu1 %vm1212_vm0, %v1211_v0 }
 0x1ca   : > { %975 = vmatmul.mubr.msk.bf16.vlgmr.msra.gmra.mrb[12].mxu1 %vm322_vm2, %v664_v21 }
 0x285   : > { %v363_v23 = vpop.f32.mrb[0].mxu1 }
 0x286   : > { %v364_v24 = vadd.f32 %v896_v22, %v363_v23  ;;  %v940_v25 = vpop.f32.mrb[1].mxu1 }
 0x287   : > { %v366_v26 = vpop.f32.mrb[2].mxu1 }
 0x288   : > { %v941_v27 = vpop.f32.mrb[3].mxu1  ;;  %v369_v28 = vsel %vm322_vm2, %v364_v24, -inf }
 0x289   : > { %370 = vmax.xlane.f32.xlu1 %v369_v28 }
 0x28d   : > { %v475_v29 = vpop.f32.mrb[4].mxu1 }
 0x28e   : > { %v476_v30 = vadd.f32 %v896_v22, %v475_v29  ;;  %v952_v31 = vpop.f32.mrb[5].mxu1 }
 0x28f   : > { %v478_v32 = vpop.f32.mrb[6].mxu1 }
 0x290   : > { %v953_v33 = vpop.f32.mrb[7].mxu1  ;;  %v481_v34 = vsel %vm322_vm2, %v476_v30, -inf }
 0x291   : > { %482 = vmax.xlane.f32.xlu0 %v481_v34 }
 0x295   : > { %v591_v35 = vpop.f32.mrb[8].mxu1 }
 0x296   : > { %v592_v36 = vadd.f32 %v896_v22, %v591_v35  ;;  %v964_v37 = vpop.f32.mrb[9].mxu1 }
 0x297   : > { %v594_v38 = vpop.f32.mrb[10].mxu1 }
 0x298   : > { %v965_v39 = vpop.f32.mrb[11].mxu1  ;;  %v597_v40 = vsel %vm322_vm2, %v592_v36, -inf }
 0x299   : > { %598 = vmax.xlane.f32.xlu0 %v597_v40 }
 0x29d   : > { %v707_v41 = vpop.f32.mrb[12].mxu1 }
 0x29e   : > { %v708_v42 = vadd.f32 %v896_v22, %v707_v41  ;;  %v976_v43 = vpop.f32.mrb[13].mxu1 }
 0x29f   : > { %v710_v44 = vpop.f32.mrb[14].mxu1 }
 0x2a0   : > { %v977_v45 = vpop.f32.mrb[15].mxu1  ;;  %v713_v46 = vsel %vm322_vm2, %v708_v42, -inf }
 0x2a1   : > { %714 = vmax.xlane.f32.xlu1 %v713_v46 }
 0x316   : > { %v371_v47 = vpop.xlane.xlu1 %370 }
 0x317   : > { %v372_v48 = vsub.f32 %v364_v24, %v371_v47 }
 0x319   : > { %v373_v49 = vmul.f32 1.442695, %v372_v48 }
 0x31b   : > { %1061 = vpow2.f32 %v373_v49 }
 0x31e   : > { %v483_v50 = vpop.xlane.xlu0 %482 }
 0x31f   : > { %v484_v51 = vsub.f32 %v476_v30, %v483_v50 }
 0x321   : > { %v485_v52 = vmul.f32 1.442695, %v484_v51 }
 0x323   : > { %1063 = vpow2.f32 %v485_v52 }
 0x325   : > { %v1062_v53 = vpop.eup %1061 }
 0x326   : > { %v599_v54 = vpop.xlane.xlu0 %598  ;;  %v375_v55 = vsel %vm322_vm2, %v1062_v53, 0.0 }
 0x327   : > { %v600_v56 = vsub.f32 %v592_v36, %v599_v54  ;;  %376 = vadd.xlane.f32.xlu0 %v375_v55 }
 0x329   : > { %v601_v57 = vmul.f32 1.442695, %v600_v56 }
 0x32b   : > { %1065 = vpow2.f32 %v601_v57 }
 0x32d   : > { %v1064_v58 = vpop.eup %1063 }
 0x32e   : > { %v487_v59 = vsel %vm322_vm2, %v1064_v58, 0.0  ;;  %v715_v62 = vpop.xlane.xlu1 %714 }
 0x32f   : > { %488 = vadd.xlane.f32.xlu1 %v487_v59  ;;  %v716_v63 = vsub.f32 %v708_v42, %v715_v62 }
 0x331   : > { %v717_v1 = vmul.f32 1.442695, %v716_v63 }
 0x333   : > { %1067 = vpow2.f32 %v717_v1 }
 0x335   : > { %v1066_v60 = vpop.eup %1065 }
 0x336   : > { %v603_v61 = vsel %vm322_vm2, %v1066_v60, 0.0 }
 0x337   : > { %604 = vadd.xlane.f32.xlu0 %v603_v61 }
 0x33d   : > { %v1068_v2 = vpop.eup %1067 }
 0x33e   : > { %v719_v3 = vsel %vm322_vm2, %v1068_v2, 0.0 }
 0x340   : > { %493 = vrot.lane.b32.xlu1 %v1414_v9, %s1220_s11  ;;  %s1139_s11 = sshll.u32 %s1227_s19, 4  ;;  %s1140_s11 = int_to_ptr.vmem [resolvable:$false] %s1139_s11 }
 0x341   : > { %p1142_p13 = scmp.lt.s32.totalorder %s1489_s20, %s1140_s11 }
 0x34d   : > { %381 = vrot.lane.b32.xlu0 %v1414_v9, %s1221_s12  ;;  %s1141_s12 = scalar_lea.vmem %s1140_s11, 256 }
 0x34e   : > { %p1143_p3 = scmp.lt.s32.totalorder %s1141_s12, %s1135_s8 }
 0x350   : > { %p1144_p7 = por %p1143_p3, %p1142_p13 }
 0x351   : > { %725 = vrot.lane.b32.xlu0 %v1414_v9, %s1222_s13 }
 0x352   : > { %p1145_p9 = pnand %p1144_p7, %p1138_p10 }
 0x364   : > { %720 = vadd.xlane.f32.xlu1 %v719_v3 }
 0x375   : > { %609 = vrot.lane.b32.xlu1 %v1414_v9, %s1223_s21 }
 0x3b4   : > { %v377_v4 = vpop.xlane.xlu0 %376 }
 0x3b5   : > { %1069 = vrcp.f32 %v377_v4 }
 0x3bc   : > { %v489_v5 = vpop.xlane.xlu1 %488 }
 0x3bd   : > { %1071 = vrcp.f32 %v489_v5 }
 0x3bf   : > { %v1070_v6 = vpop.eup %1069 }
 0x3c0   : > { %v379_v8 = vmul.f32 %v1070_v6, %v1062_v53  ;;  %v494_v12 = vpop.permute.xlu1 %493 }
 0x3c1   : > { %v499_v15 = vsel %vm386_vm3, %v494_v12, 0 }
 0x3c2   : > { %v380_v13 = vpack.c.bf16 %v379_v8, %v379_v8 }
 0x3c4   : > { %v605_v7 = vpop.xlane.xlu0 %604 }
 0x3c5   : > { %1073 = vrcp.f32 %v605_v7 }
 0x3c7   : > { %v1072_v14 = vpop.eup %1071 }
 0x3c8   : > { %v382_v10 = vpop.permute.xlu0 %381  ;;  %v491_v9 = vmul.f32 %v1072_v14, %v1064_v58 }
 0x3c9   : > { %v388_v11 = vsel %vm386_vm3, %v382_v10, 0 }
 0x3ca   : > { %943 = vmatpush3.bf16.msra.mxu0 %v388_v11  ;;  %v492_v16 = vpack.c.bf16 %v491_v9, %v491_v9 }
 0x3cb   : > { %954 = vmatprep.subr.bf16.mxu0 %v1211_v0 }
 0x3cc   : > { %v726_v22 = vpop.permute.xlu0 %725 }
 0x3cd   : > { %945 = vmatmul.mubr.msk.bf16.vlgmr.msra.gmra.mrb[4].mxu0 %vm322_vm2, %v380_v13  ;;  %v731_v24 = vsel %vm386_vm3, %v726_v22, 0 }
 0x3ce   : > { %955 = vmatpush3.bf16.msra.mxu0 %v499_v15  ;;  %956 = vmatprep.mubr.msk.bf16.mxu0 %vm1212_vm0, %v1211_v0 }
 0x3cf   : > { %966 = vmatprep.subr.bf16.mxu0 %v1211_v0  ;;  %v1074_v17 = vpop.eup %1073 }
 0x3d0   : > { %v607_v19 = vmul.f32 %v1074_v17, %v1066_v60 }
 0x3d2   : > { %v608_v23 = vpack.c.bf16 %v607_v19, %v607_v19 }
 0x3d5   : > { %957 = vmatmul.mubr.msk.bf16.vlgmr.msra.gmra.mrb[8].mxu0 %vm322_vm2, %v492_v16 }
 0x3d6   : > { %968 = vmatprep.mubr.msk.bf16.mxu0 %vm1212_vm0, %v1211_v0 }
 0x3f1   : > { %v721_v18 = vpop.xlane.xlu1 %720 }
 0x3f2   : > { %1075 = vrcp.f32 %v721_v18 }
 0x3f5   : > { %v610_v20 = vpop.permute.xlu1 %609 }
 0x3f6   : > { %v615_v21 = vsel %vm386_vm3, %v610_v20, 0 }
 0x3f7   : > { %967 = vmatpush3.bf16.msra.mxu0 %v615_v21 }
 0x3f8   : > { %978 = vmatprep.subr.bf16.mxu0 %v1211_v0 }
 0x3fa   : > { %969 = vmatmul.mubr.msk.bf16.vlgmr.msra.gmra.mrb[12].mxu0 %vm322_vm2, %v608_v23 }
 0x3fb   : > { %979 = vmatpush3.bf16.msra.mxu0 %v731_v24  ;;  %980 = vmatprep.mubr.msk.bf16.mxu0 %vm1212_vm0, %v1211_v0 }
 0x3fc   : > { %v1076_v25 = vpop.eup %1075 }
 0x3fd   : > { %v723_v26 = vmul.f32 %v1076_v25, %v1068_v2 }
 0x3ff   : > { %v724_v27 = vpack.c.bf16 %v723_v26, %v723_v26 }
 0x402   : > { %981 = vmatmul.mubr.msk.bf16.vlgmr.msra.gmra.mrb[16].mxu0 %vm322_vm2, %v724_v27 }
 0x4a0   : > { %v424_v28 = vpop.f32.mrb[4].mxu0 }
 0x4a1   : > { %430 = vst.msk [vmem:[%s1476_s9] sm:$0xff] %vm322_vm2, %v424_v28  ;;  %v946_v29 = vpop.f32.mrb[5].mxu0 }
 0x4a2   : > { %v427_v30 = vpop.f32.mrb[6].mxu0 }
 0x4a3   : > { %v947_v31 = vpop.f32.mrb[7].mxu0 }
 0x4a8   : > { %v535_v32 = vpop.f32.mrb[8].mxu0 }
 0x4a9   : > { %542 = vrot.lane.b32.xlu1 %v535_v32, %s1224_s28  ;;  %v958_v33 = vpop.f32.mrb[9].mxu0 }
 0x4aa   : > { %v538_v0 = vpop.f32.mrb[10].mxu0 }
 0x4ab   : > { %v959_v34 = vpop.f32.mrb[11].mxu0 }
 0x4cd   : > { %v651_v35 = vpop.f32.mrb[12].mxu0 }
 0x4ce   : > { %658 = vrot.lane.b32.xlu0 %v651_v35, %s1225_s29  ;;  %v970_v36 = vpop.f32.mrb[13].mxu0 }
 0x4cf   : > { %v654_v37 = vpop.f32.mrb[14].mxu0 }
 0x4d0   : > { %v971_v38 = vpop.f32.mrb[15].mxu0 }
 0x4d5   : > { %v767_v39 = vpop.f32.mrb[16].mxu0 }
 0x4d6   : > { %774 = vrot.lane.b32.xlu1 %v767_v39, %s1226_s10  ;;  %v982_v40 = vpop.f32.mrb[17].mxu0 }
 0x4d7   : > { %v770_v41 = vpop.f32.mrb[18].mxu0 }
 0x4d8   : > { %v983_v42 = vpop.f32.mrb[19].mxu0 }
 0x51b   : > { %v543_v43 = vpop.permute.xlu1 %542 }
 0x51c   : > { %546 = vst.msk [vmem:[%s1476_s9] sm:$0xff] %vm545_vm4, %v543_v43 }
 0x540   : > { %v659_v44 = vpop.permute.xlu0 %658 }
 0x541   : > { %662 = vst.msk [vmem:[%s1476_s9] sm:$0xff] %vm661_vm5, %v659_v44 }
 0x548   : > { %v775_v45 = vpop.permute.xlu1 %774 }
 0x549   : > { %778 = vst.msk [vmem:[%s1476_s9] sm:$0xff] %vm777_vm6, %v775_v45 }
 0x54a   : > { %1148 = shalt.err (!%p1145_p9)
}
 0x54b   : > { %s1149_s25 = scalar_lea.hbm %s1487_s7, 128  ;;  %s1153_s23 = scalar_lea.hbm %s1536_s4, 256 }
 0x54c   : > { %p1150_p2 = scmp.ne.s32.totalorder %s1487_s7, %s1149_s25  ;;  %p1154_p1 = scmp.lt.u32.totalorder %s1487_s7, %s1536_s4 }
 0x54d   : > { %p1155_p11 = scmp.lt.u32.totalorder %s1153_s23, %s1149_s25  ;;  %p1157_p6 = scmp.lt.u32.totalorder %s1149_s25, %s1487_s7 }
 0x54e   : > { %p1151_p5 = pnand %p1150_p2, %p1344_p12 }
 0x54f   : > { %p1156_p4 = por %p1155_p11, %p1154_p1 }
 0x550   : > { %p1152_p0 = pneg %p1151_p5 }
 0x551   : > { %p1158_p8 = por %p1157_p6, %p1156_p4 }
 0x553   : > { %p1159_p10 = pnand %p1158_p8, %p1152_p0 }
 0x555   : > { %1162 = shalt.err (!%p1159_p10)
}
 0x556   : > { %990 = dma.vmem_to_hbm [thread:$0]  (%p1344_p12), %s1489_s20, 128, %s1487_s7, %s780_s26  }
 0x557 PF: > { %s805_s29 = sand.u32 1, %s1193_s15   ;;  %p1551_p13 = scmp.ne.s32.totalorder %s1541_s22, 0 }
 0x558   : > { %p1552_p3 = scmp.ge.s32.totalorder %s1205_s18, 2  ;;  %s806_s10 = scalar_lea.sflag [#allocation4], %s805_s29 }
 0x55a   : > { %p1001_p7 = pnand %p1552_p3, %p1551_p13 }
 0x55c   : > { %1188 = dma.done.wait (!%p1001_p7), %s806_s10, 128  }
 0x55d   : > { %1190 = vsyncadd (!%p1001_p7), %s806_s10, 4294967168  ;;  %p18_p9 = scmp.ge.s32.totalorder %s1309_s27, 4   ;;  %s1553_s15 = smov %s1197_s16 }
 0x55e   : > { %s1554_s16 = smov %s1201_s17  ;;  %s1555_s17 = smov %s1340_s24 }
 0x55f   : > { %s1556_s18 = smov %s1309_s27  ;;  %20 = sbr.rel (!%p18_p9) target bundleno = 6 (0x6), region = 88 }
 0x566   :  { %811 = vsyncpa [#allocation3], 1 }
 0x567   :  { %813 = vsyncpa [#allocation3 + $0x1], 1 }
 0x568   :  { %814 = vsyncpa [#allocation6], 1 }
 0x569   :  { %815 = vsyncpa [#allocation4], 1 }
 0x56a   :  { %817 = vsyncpa [#allocation4 + $0x1], 1 }

</bundles_post_ra>
